<compile_context>
chip_gen: v5e
topology: v5e:2x2
jax: 0.10.0
libtpu: 0.0.40
codegen_flags: <defaults>
</compile_context>

<pallas_src>
import functools
import math

import jax
import jax.numpy as jnp
from jax.experimental import pallas as pl
from jax.experimental.pallas import tpu as pltpu

_LOG_2PI = math.log(2.0 * math.pi)


def _round_up(x, m):
    return (x + m - 1) // m * m


def _personalizer_kernel(z_ref, w_ref, a_ref, wfw_ref, wfe_ref, wz_ref, b_ref,
                         o_ref, *, a_dim, h_dim, z_dim, n_rows, block_n,
                         mm_dtype):
    i = pl.program_id(0)

    @pl.when(i == 0)
    def _():
        o_ref[0, 0] = jnp.float32(0.0)

    # Packed bias row (f32): [ bfw | bfe | bzm | bzv ]
    b_fw = b_ref[:, :a_dim]
    b_fe = b_ref[:, a_dim:a_dim + h_dim]
    b_z = b_ref[:, a_dim + h_dim:a_dim + h_dim + 2 * z_dim]

    # h1 = relu(W @ Wfw + bfw + A)                     [block_n, a_dim]
    h1 = jnp.dot(w_ref[...], wfw_ref[...], preferred_element_type=jnp.float32)
    h1 = jnp.maximum(h1 + b_fw + a_ref[...], 0.0)

    # latent = relu(h1 @ Wfe + bfe)                    [block_n, h_dim]
    latent = jnp.dot(h1.astype(mm_dtype), wfe_ref[...],
                     preferred_element_type=jnp.float32)
    latent = jnp.maximum(latent + b_fe, 0.0)

    # Fused zm/zv projection                            [block_n, 2*z_dim]
    zz = jnp.dot(latent.astype(mm_dtype), wz_ref[...],
                 preferred_element_type=jnp.float32) + b_z
    mu = zz[:, :z_dim]
    log_var = jnp.tanh(zz[:, z_dim:])

    diff = (z_ref[...] - mu) * jnp.exp(-log_var)
    contrib = log_var + 0.5 * diff * diff             # [block_n, z_dim]

    if n_rows % block_n != 0:  # mask zero-padded rows (static check)
        row = i * block_n + jax.lax.broadcasted_iota(jnp.int32, (block_n, 1), 0)
        contrib = jnp.where(row < n_rows, contrib, 0.0)

    # Accumulate the (negated) partial sum in the resident SMEM output.
    o_ref[0, 0] = o_ref[0, 0] - jnp.sum(contrib)

    @pl.when(i == pl.num_programs(0) - 1)
    def _():
        n_total = n_rows * z_dim
        o_ref[0, 0] = (o_ref[0, 0] - 0.5 * n_total * _LOG_2PI) / n_total


def personalizer_forward(Z, W, A, params, *, block_n=512, use_bf16=True):
    """Matches Personalizer.forward: returns (res, None)."""
    wfw, bfw, wfe, bfe, wzm, bzm, wzv, bzv = params
    N, z_dim = Z.shape
    w_dim = W.shape[1]
    a_dim = A.shape[1]
    h_dim = wfe.shape[1]

    mm_dtype = jnp.bfloat16 if use_bf16 else jnp.float32

    # Fuse zm/zv weights; pack the four bias rows into one row (fewer DMAs).
    wz = jnp.concatenate([wzm, wzv], axis=1).astype(mm_dtype)   # [h, 2z]
    bias = jnp.concatenate([bfw, bfe, bzm, bzv], axis=1)        # [1, a+h+2z] f32
    wfw_c = wfw.astype(mm_dtype)
    wfe_c = wfe.astype(mm_dtype)
    W_c = W.astype(mm_dtype)

    # Batch tiling: M is the only dim that amortizes the MXU / grid overhead.
    bn = min(block_n, _round_up(N, 8))
    num_tiles = pl.cdiv(N, bn)
    n_pad = num_tiles * bn - N
    if n_pad:
        Z_p = jnp.pad(Z, ((0, n_pad), (0, 0)))
        W_p = jnp.pad(W_c, ((0, n_pad), (0, 0)))
        A_p = jnp.pad(A, ((0, n_pad), (0, 0)))
    else:
        Z_p, W_p, A_p = Z, W_c, A

    kernel = functools.partial(
        _personalizer_kernel,
        a_dim=a_dim, h_dim=h_dim, z_dim=z_dim,
        n_rows=N, block_n=bn, mm_dtype=mm_dtype)

    batch_map = lambda i: (i, 0)
    const_map = lambda i: (0, 0)

    res = pl.pallas_call(
        kernel,
        out_shape=jax.ShapeDtypeStruct((1, 1), jnp.float32),
        grid=(num_tiles,),
        in_specs=[
            pl.BlockSpec((bn, z_dim), batch_map),
            pl.BlockSpec((bn, w_dim), batch_map),
            pl.BlockSpec((bn, a_dim), batch_map),
            pl.BlockSpec((w_dim, a_dim), const_map),
            pl.BlockSpec((a_dim, h_dim), const_map),
            pl.BlockSpec((h_dim, 2 * z_dim), const_map),
            pl.BlockSpec((1, a_dim + h_dim + 2 * z_dim), const_map),
        ],
        out_specs=pl.BlockSpec(memory_space=pltpu.MemorySpace.SMEM),
        compiler_params=pltpu.CompilerParams(
            dimension_semantics=("arbitrary",)),
    )(Z_p, W_p, A_p, wfw_c, wfe_c, wz, bias)
    return res[0, 0], None


def init_params(key, w_dim, a_dim, z_dim, h_dim):
    ks = jax.random.split(key, 8)

    def lin(kw, kb, din, dout):
        w = jax.random.normal(kw, (din, dout), jnp.float32) * (1.0 / math.sqrt(din))
        b = jax.random.normal(kb, (1, dout), jnp.float32) * 0.01
        return w, b

    wfw, bfw = lin(ks[0], ks[1], w_dim, a_dim)
    wfe, bfe = lin(ks[2], ks[3], a_dim, h_dim)
    wzm, bzm = lin(ks[4], ks[5], h_dim, z_dim)
    wzv, bzv = lin(ks[6], ks[7], h_dim, z_dim)
    return (wfw, bfw, wfe, bfe, wzm, bzm, wzv, bzv)


def _reference_forward(Z, W, A, params, use_bf16=True):
    """Pure-JAX reference mirroring the kernel's matmul precision."""
    wfw, bfw, wfe, bfe, wzm, bzm, wzv, bzv = params
    mm = jnp.bfloat16 if use_bf16 else jnp.float32
    z_dim = Z.shape[1]
    h1 = jax.nn.relu(
        jnp.dot(W.astype(mm), wfw.astype(mm),
                preferred_element_type=jnp.float32) + bfw + A)
    latent = jax.nn.relu(
        jnp.dot(h1.astype(mm), wfe.astype(mm),
                preferred_element_type=jnp.float32) + bfe)
    wz = jnp.concatenate([wzm, wzv], axis=1).astype(mm)
    bz = jnp.concatenate([bzm, bzv], axis=1)
    zz = jnp.dot(latent.astype(mm), wz, preferred_element_type=jnp.float32) + bz
    mu = zz[:, :z_dim]
    log_var = jnp.tanh(zz[:, z_dim:])
    n = Z.shape[0] * Z.shape[1]
    res = (-0.5 * n * _LOG_2PI
           - jnp.sum(log_var)
           - 0.5 * jnp.sum(((Z - mu) * jnp.exp(-log_var)) ** 2))
    return res / n


if __name__ == "__main__":
    # Small, module-consistent shapes.
    N, w_dim, a_dim, z_dim, h_dim = 8, 16, 32, 8, 32

    key = jax.random.PRNGKey(0)
    k_p, k_z, k_w, k_a = jax.random.split(key, 4)

    params = init_params(k_p, w_dim, a_dim, z_dim, h_dim)
    Z = jax.random.normal(k_z, (N, z_dim), jnp.float32)
    W = jax.random.normal(k_w, (N, w_dim), jnp.float32)
    A = jax.random.normal(k_a, (N, a_dim), jnp.float32)

    res, _ = personalizer_forward(Z, W, A, params)
    res = jax.block_until_ready(res)
    ref = jax.block_until_ready(_reference_forward(Z, W, A, params))
    assert jnp.allclose(res, ref, rtol=1e-3, atol=1e-3), (res, ref)

    # Larger case exercising the grid, double-buffering and padding mask.
    N2 = 300
    k_z2, k_w2, k_a2 = jax.random.split(jax.random.PRNGKey(1), 3)
    Z2 = jax.random.normal(k_z2, (N2, z_dim), jnp.float32)
    W2 = jax.random.normal(k_w2, (N2, w_dim), jnp.float32)
    A2 = jax.random.normal(k_a2, (N2, a_dim), jnp.float32)

    res2, _ = personalizer_forward(Z2, W2, A2, params, block_n=128)
    res2 = jax.block_until_ready(res2)
    ref2 = jax.block_until_ready(_reference_forward(Z2, W2, A2, params))
    assert jnp.allclose(res2, ref2, rtol=1e-3, atol=1e-3), (res2, ref2)

    print("KERNEL_OK")
</pallas_src>

<mosaic_0001>
module attributes {stable_mosaic.version = 11 : i64} {
  func.func @_personalizer_kernel(%arg0: i32, %arg1: memref<8x8xf32, #tpu.memory_space<vmem>>, %arg2: memref<8x16xbf16, #tpu.memory_space<vmem>>, %arg3: memref<8x32xf32, #tpu.memory_space<vmem>>, %arg4: memref<16x32xbf16, #tpu.memory_space<vmem>>, %arg5: memref<32x32xbf16, #tpu.memory_space<vmem>>, %arg6: memref<32x16xbf16, #tpu.memory_space<vmem>>, %arg7: memref<1x80xf32, #tpu.memory_space<vmem>>, %arg8: memref<1x1xf32, #tpu.memory_space<smem>>) attributes {dimension_semantics = [#tpu.dimension_semantics<arbitrary>], iteration_bounds = array<i64: 1>, scalar_prefetch = 0 : i64, scratch_operands = 0 : i64, tpu.core_type = #tpu.core_type<tc>, window_params = [{transform_indices = @transform_0, window_bounds = array<i64: 8, 8>}, {transform_indices = @transform_1, window_bounds = array<i64: 8, 16>}, {transform_indices = @transform_2, window_bounds = array<i64: 8, 32>}, {pipeline_mode = #tpu.pipeline_mode<synchronous>, transform_indices = @transform_3, window_bounds = array<i64: 16, 32>}, {pipeline_mode = #tpu.pipeline_mode<synchronous>, transform_indices = @transform_4, window_bounds = array<i64: 32, 32>}, {pipeline_mode = #tpu.pipeline_mode<synchronous>, transform_indices = @transform_5, window_bounds = array<i64: 32, 16>}, {pipeline_mode = #tpu.pipeline_mode<synchronous>, transform_indices = @transform_6, window_bounds = array<i64: 1, 80>}, {transform_indices = @transform_7, window_bounds = array<i64: 1, 1>}]} {
    %c0_i32 = arith.constant 0 : i32
    %0 = arith.cmpi eq, %arg0, %c0_i32 : i32
    %1 = arith.extui %0 : i1 to i32
    %c0_i32_0 = arith.constant 0 : i32
    %2 = arith.cmpi ne, %1, %c0_i32_0 : i32
    scf.if %2 {
      %cst_29 = arith.constant 0.000000e+00 : f32
      %c0_30 = arith.constant 0 : index
      %c0_31 = arith.constant 0 : index
      %50 = memref.load %arg8[%c0_30, %c0_31] : memref<1x1xf32, #tpu.memory_space<smem>>
      memref.store %cst_29, %arg8[%c0_30, %c0_31] : memref<1x1xf32, #tpu.memory_space<smem>>
    } else {
    }
    %c0 = arith.constant 0 : index
    %c0_1 = arith.constant 0 : index
    %3 = vector.load %arg7[%c0, %c0_1] : memref<1x80xf32, #tpu.memory_space<vmem>>, vector<1x32xf32>
    %c0_2 = arith.constant 0 : index
    %c32 = arith.constant 32 : index
    %4 = vector.load %arg7[%c0_2, %c32] : memref<1x80xf32, #tpu.memory_space<vmem>>, vector<1x32xf32>
    %c0_3 = arith.constant 0 : index
    %c64 = arith.constant 64 : index
    %5 = vector.load %arg7[%c0_3, %c64] : memref<1x80xf32, #tpu.memory_space<vmem>>, vector<1x16xf32>
    %c0_4 = arith.constant 0 : index
    %c0_5 = arith.constant 0 : index
    %6 = vector.load %arg2[%c0_4, %c0_5] : memref<8x16xbf16, #tpu.memory_space<vmem>>, vector<8x16xbf16>
    %c0_6 = arith.constant 0 : index
    %c0_7 = arith.constant 0 : index
    %7 = vector.load %arg4[%c0_6, %c0_7] : memref<16x32xbf16, #tpu.memory_space<vmem>>, vector<16x32xbf16>
    %cst = arith.constant dense<0.000000e+00> : vector<8x32xf32>
    %8 = tpu.matmul %6, %7, %cst {dimension_numbers = #tpu.dot_dimension_numbers<[1], [0], [0], [1], [0, 0, 1, 1], [], []>} : vector<8x16xbf16>, vector<16x32xbf16>, vector<8x32xf32> -> vector<8x32xf32>
    %9 = vector.broadcast %3 : vector<1x32xf32> to vector<8x32xf32>
    %10 = arith.addf %8, %9 : vector<8x32xf32>
    %c0_8 = arith.constant 0 : index
    %c0_9 = arith.constant 0 : index
    %11 = vector.load %arg3[%c0_8, %c0_9] : memref<8x32xf32, #tpu.memory_space<vmem>>, vector<8x32xf32>
    %12 = arith.addf %10, %11 : vector<8x32xf32>
    %cst_10 = arith.constant 0.000000e+00 : f32
    %13 = vector.broadcast %cst_10 : f32 to vector<8x32xf32>
    %14 = arith.maximumf %12, %13 : vector<8x32xf32>
    %15 = arith.truncf %14 : vector<8x32xf32> to vector<8x32xbf16>
    %c0_11 = arith.constant 0 : index
    %c0_12 = arith.constant 0 : index
    %16 = vector.load %arg5[%c0_11, %c0_12] : memref<32x32xbf16, #tpu.memory_space<vmem>>, vector<32x32xbf16>
    %cst_13 = arith.constant dense<0.000000e+00> : vector<8x32xf32>
    %17 = tpu.matmul %15, %16, %cst_13 {dimension_numbers = #tpu.dot_dimension_numbers<[1], [0], [0], [1], [0, 0, 1, 1], [], []>} : vector<8x32xbf16>, vector<32x32xbf16>, vector<8x32xf32> -> vector<8x32xf32>
    %18 = vector.broadcast %4 : vector<1x32xf32> to vector<8x32xf32>
    %19 = arith.addf %17, %18 : vector<8x32xf32>
    %cst_14 = arith.constant 0.000000e+00 : f32
    %20 = vector.broadcast %cst_14 : f32 to vector<8x32xf32>
    %21 = arith.maximumf %19, %20 : vector<8x32xf32>
    %22 = arith.truncf %21 : vector<8x32xf32> to vector<8x32xbf16>
    %c0_15 = arith.constant 0 : index
    %c0_16 = arith.constant 0 : index
    %23 = vector.load %arg6[%c0_15, %c0_16] : memref<32x16xbf16, #tpu.memory_space<vmem>>, vector<32x16xbf16>
    %cst_17 = arith.constant dense<0.000000e+00> : vector<8x16xf32>
    %24 = tpu.matmul %22, %23, %cst_17 {dimension_numbers = #tpu.dot_dimension_numbers<[1], [0], [0], [1], [0, 0, 1, 1], [], []>} : vector<8x32xbf16>, vector<32x16xbf16>, vector<8x16xf32> -> vector<8x16xf32>
    %25 = vector.broadcast %5 : vector<1x16xf32> to vector<8x16xf32>
    %26 = arith.addf %24, %25 : vector<8x16xf32>
    %27 = vector.extract_strided_slice %26 {offsets = [0, 0], sizes = [8, 8], strides = [1, 1]} : vector<8x16xf32> to vector<8x8xf32>
    %28 = vector.extract_strided_slice %26 {offsets = [0, 8], sizes = [8, 8], strides = [1, 1]} : vector<8x16xf32> to vector<8x8xf32>
    %29 = math.tanh %28 : vector<8x8xf32>
    %c0_18 = arith.constant 0 : index
    %c0_19 = arith.constant 0 : index
    %30 = vector.load %arg1[%c0_18, %c0_19] : memref<8x8xf32, #tpu.memory_space<vmem>>, vector<8x8xf32>
    %31 = arith.subf %30, %27 : vector<8x8xf32>
    %cst_20 = arith.constant 0.000000e+00 : f32
    %32 = vector.broadcast %cst_20 : f32 to vector<8x8xf32>
    %33 = arith.subf %32, %29 : vector<8x8xf32>
    %34 = math.exp %33 : vector<8x8xf32>
    %35 = arith.mulf %31, %34 : vector<8x8xf32>
    %cst_21 = arith.constant 5.000000e-01 : f32
    %36 = vector.broadcast %cst_21 : f32 to vector<8x8xf32>
    %37 = arith.mulf %36, %35 : vector<8x8xf32>
    %38 = arith.mulf %37, %35 : vector<8x8xf32>
    %39 = arith.addf %29, %38 : vector<8x8xf32>
    %c0_22 = arith.constant 0 : index
    %c0_23 = arith.constant 0 : index
    %40 = memref.load %arg8[%c0_22, %c0_23] : memref<1x1xf32, #tpu.memory_space<smem>>
    %41 = vector.shape_cast %39 : vector<8x8xf32> to vector<1x8x8xf32>
    %cst_24 = arith.constant dense<0.000000e+00> : vector<1xf32>
    %42 = vector.multi_reduction <add>, %41, %cst_24 [1, 2] : vector<1x8x8xf32> to vector<1xf32>
    %43 = vector.shape_cast %42 : vector<1xf32> to vector<1x1x1xf32>
    %44 = vector.extract %43[0, 0, 0] : f32 from vector<1x1x1xf32>
    %45 = arith.subf %40, %44 : f32
    %c0_25 = arith.constant 0 : index
    %c0_26 = arith.constant 0 : index
    %46 = memref.load %arg8[%c0_25, %c0_26] : memref<1x1xf32, #tpu.memory_space<smem>>
    memref.store %45, %arg8[%c0_25, %c0_26] : memref<1x1xf32, #tpu.memory_space<smem>>
    %c0_i32_27 = arith.constant 0 : i32
    %47 = arith.cmpi eq, %arg0, %c0_i32_27 : i32
    %48 = arith.extui %47 : i1 to i32
    %c0_i32_28 = arith.constant 0 : i32
    %49 = arith.cmpi ne, %48, %c0_i32_28 : i32
    scf.if %49 {
      %c0_29 = arith.constant 0 : index
      %c0_30 = arith.constant 0 : index
      %50 = memref.load %arg8[%c0_29, %c0_30] : memref<1x1xf32, #tpu.memory_space<smem>>
      %cst_31 = arith.constant 58.8120651 : f32
      %51 = arith.subf %50, %cst_31 : f32
      %cst_32 = arith.constant 6.400000e+01 : f32
      %52 = arith.divf %51, %cst_32 : f32
      %c0_33 = arith.constant 0 : index
      %c0_34 = arith.constant 0 : index
      %53 = memref.load %arg8[%c0_33, %c0_34] : memref<1x1xf32, #tpu.memory_space<smem>>
      memref.store %52, %arg8[%c0_33, %c0_34] : memref<1x1xf32, #tpu.memory_space<smem>>
    } else {
    }
    return
  }
  func.func @transform_0(%arg0: i32) -> (i32, i32) {
    %c0_i32 = arith.constant 0 : i32
    %c0_i32_0 = arith.constant 0 : i32
    return %arg0, %c0_i32 : i32, i32
  }
  func.func @transform_1(%arg0: i32) -> (i32, i32) {
    %c0_i32 = arith.constant 0 : i32
    %c0_i32_0 = arith.constant 0 : i32
    return %arg0, %c0_i32 : i32, i32
  }
  func.func @transform_2(%arg0: i32) -> (i32, i32) {
    %c0_i32 = arith.constant 0 : i32
    %c0_i32_0 = arith.constant 0 : i32
    return %arg0, %c0_i32 : i32, i32
  }
  func.func @transform_3(%arg0: i32) -> (i32, i32) {
    %c0_i32 = arith.constant 0 : i32
    %c0_i32_0 = arith.constant 0 : i32
    %c0_i32_1 = arith.constant 0 : i32
    return %c0_i32, %c0_i32_0 : i32, i32
  }
  func.func @transform_4(%arg0: i32) -> (i32, i32) {
    %c0_i32 = arith.constant 0 : i32
    %c0_i32_0 = arith.constant 0 : i32
    %c0_i32_1 = arith.constant 0 : i32
    return %c0_i32, %c0_i32_0 : i32, i32
  }
  func.func @transform_5(%arg0: i32) -> (i32, i32) {
    %c0_i32 = arith.constant 0 : i32
    %c0_i32_0 = arith.constant 0 : i32
    %c0_i32_1 = arith.constant 0 : i32
    return %c0_i32, %c0_i32_0 : i32, i32
  }
  func.func @transform_6(%arg0: i32) -> (i32, i32) {
    %c0_i32 = arith.constant 0 : i32
    %c0_i32_0 = arith.constant 0 : i32
    %c0_i32_1 = arith.constant 0 : i32
    return %c0_i32, %c0_i32_0 : i32, i32
  }
  func.func @transform_7(%arg0: i32) -> (i32, i32) {
    %c0_i32 = arith.constant 0 : i32
    %c0_i32_0 = arith.constant 0 : i32
    %c0_i32_1 = arith.constant 0 : i32
    return %c0_i32, %c0_i32_0 : i32, i32
  }
}

</mosaic_0001>

<bundles_post_ra>
// kernel: tpu_custom_call.1
= control target key start
LH: loop header
LB: loop body
LE: loop exit
PB: predicated region body
PF: predicated region fallthrough
CT: control target
= control target key end

     0   :  { %12 = vsyncpa [#allocation3], 0  ;;  %s474_s0 = inlined_call_operand.vmem [shape: f32[8,8], index: 0, kind: input, shape index: {}]   ;;  %s475_s1 = inlined_call_operand.hbm [shape: bf16[8,16], index: 1, kind: input, shape index: {}]   ;;  %s476_s2 = inlined_call_operand.hbm [shape: f32[8,32], index: 2, kind: input, shape index: {}]   ;;  %s477_s3 = inlined_call_operand.hbm [shape: bf16[16,32], index: 3, kind: input, shape index: {}]   ;;  %s478_s4 = inlined_call_operand.vmem [shape: bf16[32,32], index: 4, kind: input, shape index: {}]   ;;  %s479_s5 = inlined_call_operand.vmem [shape: bf16[32,16], index: 5, kind: input, shape index: {}]   ;;  %s480_s6 = inlined_call_operand.vmem [shape: f32[1,80], index: 6, kind: input, shape index: {}]   ;;  %s481_s7 = inlined_call_operand.hbm [shape: f32[1,1], index: 7, kind: output, shape index: {}]  }
   0x1   :  { %13 = vsyncpa [#allocation6], 0  ;;  %s33_s26 = sshll.u32 %s476_s2, 4  ;;  %s34_s26 = int_to_ptr.hbm [resolvable:$true] %s33_s26 }
   0x2   :  { %14 = vsyncpa [#allocation4], 0  ;;  %s394_s27 = smov [#allocation5]   ;;  %s22_s8 = sshll.u32 %s475_s1, 4  ;;  %s23_s8 = int_to_ptr.hbm [resolvable:$true] %s22_s8 }
   0x3   :  { %s35_s28 = sshll.u32 %s394_s27, 4  ;;  %s395_s9 = smov [#allocation2]   ;;  %s36_s28 = int_to_ptr.vmem [resolvable:$true] %s35_s28 }
   0x4   :  { %38 = dma.hbm_to_vmem [thread:$0]  %s34_s26, 128, %s36_s28, [#allocation6]  }
   0x5   :  { %s24_s10 = sshll.u32 %s395_s9, 4  ;;  %s43_s13 = sshll.u32 %s477_s3, 4  ;;  %s25_s10 = int_to_ptr.vmem [resolvable:$true] %s24_s10  ;;  %s44_s13 = int_to_ptr.hbm [resolvable:$true] %s43_s13 }
   0x6   :  { %27 = dma.hbm_to_vmem [thread:$0]  %s23_s8, 64, %s25_s10, [#allocation3]  }
   0x7   :  { %s396_s2 = smov [#allocation7]   ;;  %s397_s15 = smov 64  }
   0x8   :  { %s45_s14 = sshll.u32 %s396_s2, 4  ;;  %s398_s16 = smov 4   ;;  %s46_s14 = int_to_ptr.vmem [resolvable:$true] %s45_s14 }
   0x9   :  { %51 = dma.hbm_to_vmem [thread:$0]  %s44_s13, 128, %s46_s14, [#allocation6], %s397_s15, %s397_s15, %s398_s16  }
   0xa   :  { %388 = dma.done.wait [#allocation3], 64  }
   0xb   :  { %389 = vsyncadd [#allocation3], 4294967232 }
   0xc   :  { %390 = dma.done.wait [#allocation6], 256  }
   0xd   :  { %391 = vsyncadd [#allocation6], 4294967040  ;;  %v277_v0 = vld [vmem:[#allocation7] sm:$0xff]  ;;  %v78_v1 = vld [vmem:[#allocation2] sm:$0xf]  ;;  %vm90_vm0 = vcmask 130048  }
   0xe   :  { %101 = vmatpush.bf16.msra.mxu0 %v277_v0  ;;  %v297_v2 = vld [vmem:[%s480_s6] ss:$0 sm:$0xff]  ;;  %s399_s17 = smov 96   ;;  %v279_v3 = vld [vmem:[%s478_s4 + $0x8] sm:$0xff]  ;;  %vm130_vm1 = vcmask 261120   ;;  %s401_s26 = smov 8  }
   0xf   :  { %127 = vrot.lane.b32.xlu0 %v297_v2, %s399_s17  ;;  %140 = vmatpush.bf16.msra.mxu1 %v279_v3  ;;  %v278_v4 = vld [vmem:[%s478_s4] sm:$0xff]  ;;  %v281_v5 = vld [vmem:[%s479_s5 + $0x8] sm:$0xff]  ;;  %s400_s4 = smov 120   ;;  %vm207_vm2 = vcmask 64512   ;;  %v402_v38 = vmov 64.0   ;;  %s241_s30 = sshll.u32 %s481_s7, 4  ;;  %s242_s30 = int_to_ptr.hbm [resolvable:$true] %s241_s30 }
  0x10   :  { %177 = vmatpush.bf16.msra.mxu2 %v281_v5  ;;  %v107_v7 = vld [vmem:[#allocation5] sm:$0xff]  ;;  %s403_s11 = smov [#allocation8]  }
  0x11   :  { %257 = vmatmul.msk.bf16.vlgmr.msra.gmra.mxu0 %vm90_vm0, %v78_v1  ;;  %v280_v13 = vld [vmem:[%s479_s5] sm:$0xff] }
  0x12   :  { %v185_v28 = vld [vmem:[%s474_s0] sm:$0xff] }
  0x13   :  { %141 = vmatpush.bf16.msra.mxu1 %v278_v4 }
  0x14   :  { %178 = vmatpush.bf16.msra.mxu2 %v280_v13 }
  0x17   :  { %165 = vrot.lane.b32.xlu0 %v297_v2, %s397_s15 }
  0x81   :  { %v128_v14 = vpop.permute.xlu0 %127 }
  0x89   :  { %v166_v20 = vpop.permute.xlu0 %165 }
  0x8e   :  { %v103_v6 = vpop.f32.mrf.mxu0 }
  0x8f   :  { %v104_v8 = vadd.f32 %v297_v2, %v103_v6 }
  0x91   :  { %v108_v9 = vadd.f32 %v107_v7, %v104_v8 }
  0x93   :  { %v109_v10 = vmax.f32 %v108_v9, 0.0 }
  0x95   :  { %v110_v11 = vpack.c.bf16 %v109_v10, %v109_v10 }
  0x96   :  { %v105_v12 = vpop.f32.mrf.mxu0 }
  0x97   :  { %266 = vmatmul.msk.bf16.vlgmr.msra.gmra.mxu1 %vm130_vm1, %v110_v11 }
 0x114   :  { %v143_v15 = vpop.f32.mrf.mxu1 }
 0x115   :  { %v144_v16 = vadd.f32 %v143_v15, %v128_v14 }
 0x117   :  { %v147_v17 = vmax.f32 %v144_v16, 0.0 }
 0x119   :  { %v148_v18 = vpack.c.bf16 %v147_v17, %v147_v17 }
 0x11b   :  { %275 = vmatmul.msk.bf16.vlgmr.msra.gmra.mxu2 %vm130_vm1, %v148_v18 }
 0x11c   :  { %v145_v19 = vpop.f32.mrf.mxu1 }
 0x19e   :  { %v180_v21 = vpop.f32.mrf.mxu2 }
 0x19f   :  { %v181_v22 = vadd.f32 %v180_v21, %v166_v20 }
 0x1a1   :  { %298 = vtanh.f32 %v181_v22  ;;  %v186_v29 = vsub.f32 %v185_v28, %v181_v22 }
 0x1a6   :  { %v182_v23 = vpop.f32.mrf.mxu2 }
 0x1a7   :  { %v299_v24 = vpop.eup %298 }
 0x1a8   :  { %v187_v25 = vsub.f32 0.0, %v299_v24 }
 0x1aa   :  { %v188_v26 = vmul.f32 1.442695, %v187_v25 }
 0x1ac   :  { %300 = vpow2.f32 %v188_v26 }
 0x1ad   :  { %302 = vrcp.f32 %v402_v38 }
 0x1b2   :  { %v301_v27 = vpop.eup %300 }
 0x1b3   :  { %191 = vrot.lane.b32.xlu1 %v301_v27, %s400_s4  ;;  %v303_v39 = vpop.eup %302 }
 0x1b4   :  { %v227_v40 = vmul.f32 64.0, %v303_v39  ;;  %vm231_vm3 = vweird.f32 %v303_v39 }
 0x1b6   :  { %v228_v41 = vsub.f32 1.0, %v227_v40 }
 0x1b8   :  { %v229_v45 = vmul.f32 %v303_v39, %v228_v41 }
 0x1ba   :  { %v230_v48 = vadd.f32 %v303_v39, %v229_v45 }
 0x1bc   :  { %v232_v51 = vsel %vm231_vm3, %v303_v39, %v230_v48 }
 0x225   :  { %v192_v30 = vpop.permute.xlu1 %191 }
 0x226   :  { %v194_v31 = vmul.f32 %v192_v30, %v186_v29 }
 0x228   :  { %v195_v32 = vmul.f32 0.5, %v194_v31 }
 0x22a   :  { %v196_v33 = vmul.f32 %v195_v32, %v194_v31 }
 0x22c   :  { %198 = vrot.lane.b32.xlu1 %v196_v33, %s401_s26 }
 0x29e   :  { %v199_v34 = vpop.permute.xlu1 %198 }
 0x29f   :  { %v201_v35 = vadd.f32 %v299_v24, %v199_v34 }
 0x2a1   :  { %204 = vrot.lane.b32.xlu2 %v201_v35, %s400_s4 }
 0x2fb   :  { %v205_v36 = vpop.permute.xlu2 %204 }
 0x2fc   :  { %v208_v37 = vsel %vm207_vm2, %v205_v36, 0.0 }
 0x2fd   :  { %209 = vadd.xlane.f32.xlu2 %v208_v37 }
 0x370   :  { %v210_v42 = vpop.xlane.xlu2 %209 }
 0x371   :  { %v211_v43 = vrot.slane %v210_v42, 4 }
 0x373   :  { %v212_v44 = vadd.f32 %v211_v43, %v210_v42 }
 0x375   :  { %v213_v46 = vrot.slane %v212_v44, 2 }
 0x377   :  { %v214_v47 = vadd.f32 %v213_v46, %v212_v44 }
 0x379   :  { %v215_v49 = vrot.slane %v214_v47, 1 }
 0x37b   :  { %v216_v50 = vadd.f32 %v215_v49, %v214_v47 }
 0x37d   :  { %282 = vpush %v216_v50 }
 0x37e   :  { %284 = vpush %v232_v51 }
 0x3ae   :  { %s283_s0 = spop %282 }
 0x3af   :  { %s218_s27 = ssub.f32 0.0, %s283_s0  ;;  %s285_s8 = spop %284 }
 0x3b1   :  { %s276_s9 = sadd.f32 -58.812065, %s218_s27 }
 0x3b3   :  { %s234_s10 = smul.f32 %s285_s8, %s276_s9 }
 0x3b5   :  { %235 = sst [smem:[#allocation8]] %s234_s10 }
 0x3b6   :  { %244 = dma.smem_to_hbm %s403_s11, 16, %s242_s30, [#allocation4]  }
 0x3b7   :  { %392 = dma.done.wait [#allocation4], 16  }
 0x3b8   :  { %393 = vsyncadd [#allocation4], 4294967280 }
 0x3b9   :  { %249 = sfence }
 0x3ba   :  { %250 = vsyncpa [#allocation3], 1 }
 0x3bb   :  { %251 = vsyncpa [#allocation6], 1 }
 0x3bc   :  { %252 = vsyncpa [#allocation4], 1 }

</bundles_post_ra>
